<compile_context>
chip_gen: v5e
topology: v5e:2x2
jax: 0.10.0
libtpu: 0.0.40
codegen_flags: <defaults>
</compile_context>

<pallas_src>
import functools
import math

import jax
import jax.numpy as jnp
import numpy as np
from jax import lax
from jax.experimental import pallas as pl
from jax.experimental.pallas import tpu as pltpu


# --------------------------------------------------------------------------------------
# Kernel
# --------------------------------------------------------------------------------------
def _mhsa_kernel(x_ref, wq_ref, bq_ref, wkv_ref, bkv_ref, mask_ref, pos_ref,
                 out_ref, k_scr, v_scr, *,
                 n_heads: int, head_w: int, tq: int, cs: int, bf16_exp: bool):
    H, W = n_heads, head_w
    D = H * W
    S = k_scr.shape[0]
    qi = pl.program_id(1)

    # ---- once per batch element: chunked K/V projection into lane-dense bf16 caches ----
    @pl.when(qi == 0)
    def _():
        def proj_chunk(c, carry):
            row = pl.multiple_of(c * cs, cs)
            xc = x_ref[0, pl.ds(row, cs), :]                         # (cs, D) bf16
            kv = jnp.dot(xc, wkv_ref[...],
                         preferred_element_type=jnp.float32)         # (cs, 2D) f32 accum
            kv = kv + bkv_ref[...]                                    # fused K/V bias
            k_scr[pl.ds(row, cs), :] = kv[:, :D].astype(jnp.bfloat16)
            v_scr[pl.ds(row, cs), :] = kv[:, D:].astype(jnp.bfloat16)
            return carry
        lax.fori_loop(0, S // cs, proj_chunk, 0)

    # ---- per query tile: Q projection (softmax scale pre-folded into wq/bq on host) ----
    start = pl.multiple_of(qi * tq, tq)
    xt = x_ref[0, pl.ds(start, tq), :]                                # (tq, D) bf16
    q = jnp.dot(xt, wq_ref[...], preferred_element_type=jnp.float32) + bq_ref[...]
    q = q.astype(jnp.bfloat16)                                        # (tq, D), pre-scaled

    # additive bias (pos + mask), computed once per tile and shared by all heads
    bias = pos_ref[0].astype(jnp.float32) - 10000.0 * (1.0 - mask_ref[0])   # (tq, S)

    # ---- per-head attention: bounds the f32 live range to one (tq, S) score tile ----
    # (static lane slices of the lane-dense caches; per-head lane-offset output stores —
    #  full-width vst whenever W is a multiple of 128)
    for h in range(H):
        lo = h * W
        q_h = q[:, lo:lo + W]                                         # (tq, W) bf16
        k_h = k_scr[:, lo:lo + W]                                     # (S,  W) bf16
        v_h = v_scr[:, lo:lo + W]                                     # (S,  W) bf16

        s = jnp.einsum("qw,kw->qk", q_h, k_h,
                       preferred_element_type=jnp.float32)            # (tq, S) f32
        s = s + bias
        s = s - jnp.max(s, axis=-1, keepdims=True)
        if bf16_exp:
            p = jnp.exp(s.astype(jnp.bfloat16))                        # bf16 EUP (v6e/v7x)
        else:
            p = jnp.exp(s).astype(jnp.bfloat16)                        # f32 EUP (v5e etc.)
        l = jnp.sum(p.astype(jnp.float32), axis=-1, keepdims=True)     # (tq, 1) f32

        o = jnp.dot(p, v_h, preferred_element_type=jnp.float32)        # (tq, W) f32
        o = o * pl.reciprocal(l, approx=True)                          # post-PV normalize
        out_ref[0, :, lo:lo + W] = o.astype(out_ref.dtype)


# --------------------------------------------------------------------------------------
# Host-side tiling / VMEM accounting helpers
# --------------------------------------------------------------------------------------
def _choose_chunk(S: int) -> int:
    """Row-chunk size for the qi==0 K/V projection."""
    for c in (512, 256, 128, 64, 32, 16, 8):
        if S % c == 0:
            return c
    return S


def _vmem_estimate(S: int, D: int, tq: int, cs: int) -> int:
    est = 2 * S * D * 2                        # K + V bf16 caches (persistent scratch)
    est += S * D * 2                           # x block (bf16, single-buffered)
    est += 3 * D * D * 2 + 3 * D * 4 + S * 4   # weights / biases / mask (single-buffered)
    est += 2 * tq * S * 2                      # pos tile (bf16, double-buffered)
    est += 2 * tq * D * 4                      # out tile (f32, double-buffered)
    est += tq * S * 4 + tq * S * 2             # one head's f32 scores + bf16 probs
    est += tq * D * 4 + cs * 2 * D * 4         # f32 Q tile + f32 projection chunk
    return est


def _choose_tq(S: int, D: int, cs: int, budget: int = 44 * 1024 * 1024) -> int:
    """Largest multiple-of-8 divisor of S (<=512) whose VMEM footprint fits the budget."""
    if S <= 512:
        return S
    cands = [t for t in range(512, 7, -8) if S % t == 0]
    if not cands:
        return S          # TODO(synk): ragged tail masking instead of one full-S tile
    for t in cands:
        if _vmem_estimate(S, D, t, cs) <= budget:
            return t
    return cands[-1]


def _use_bf16_exp() -> bool:
    """bf16 EUP exists on v6e/v7x; keep f32 exp on older generations."""
    try:
        kind = jax.devices()[0].device_kind.lower()
    except Exception:
        return False
    return ("v6" in kind) or ("v7" in kind) or ("7x" in kind)


# --------------------------------------------------------------------------------------
# Wrapper
# --------------------------------------------------------------------------------------
def mhsa_forward(x, wq, bq, wk, bk, wv, bv, mask, pos, n_heads):
    """x:(B,S,D)  wq/wk/wv:(D,D) nn.Linear weights  b*:(D,)  mask:(B,S)  pos:(B,S,S)"""
    B, S, D = x.shape
    assert D % n_heads == 0
    W = D // n_heads
    scale = 1.0 / math.sqrt(W)

    # Host-side glue: pre-transpose nn.Linear weights, fold the 1/sqrt(W) softmax scale
    # into Wq/bq, fuse K/V weights into one (D, 2D) matrix; matmul operands ship as bf16
    # (f32 accumulation stays in-kernel).
    wq_t = (wq.T * scale).astype(jnp.bfloat16)                               # (D, D)
    bq_s = (bq * scale).reshape(1, D).astype(jnp.float32)                    # (1, D)
    wkv = jnp.concatenate([wk.T, wv.T], axis=1).astype(jnp.bfloat16)         # (D, 2D)
    bkv = jnp.concatenate([bk, bv]).reshape(1, 2 * D).astype(jnp.float32)    # (1, 2D)
    mask3 = mask.astype(jnp.float32).reshape(B, 1, S)                        # (B, 1, S)
    pos_bf = pos.astype(jnp.bfloat16)                                        # (B, S, S)
    x_bf = x.astype(jnp.bfloat16)                                            # (B, S, D)

    cs = _choose_chunk(S)
    tq = _choose_tq(S, D, cs)
    nq = S // tq

    kernel = functools.partial(_mhsa_kernel, n_heads=n_heads, head_w=W,
                               tq=tq, cs=cs, bf16_exp=_use_bf16_exp())

    # Constant / per-batch-constant inputs: single pipeline buffer (no double-buffering).
    def _const_spec(shape, index_map):
        return pl.BlockSpec(shape, index_map, pipeline_mode=pl.Buffered(1))

    return pl.pallas_call(
        kernel,
        out_shape=jax.ShapeDtypeStruct((B, S, D), jnp.float32),
        grid_spec=pltpu.PrefetchScalarGridSpec(
            num_scalar_prefetch=0,
            grid=(B, nq),                                        # query tiles innermost
            in_specs=[
                _const_spec((1, S, D), lambda b, q: (b, 0, 0)),       # x (bf16, per-batch)
                _const_spec((D, D), lambda b, q: (0, 0)),             # Wq^T * scale (bf16)
                _const_spec((1, D), lambda b, q: (0, 0)),             # bq * scale (f32)
                _const_spec((D, 2 * D), lambda b, q: (0, 0)),         # [Wk|Wv]^T (bf16)
                _const_spec((1, 2 * D), lambda b, q: (0, 0)),         # [bk|bv] (f32)
                _const_spec((1, 1, S), lambda b, q: (b, 0, 0)),       # mask (per-batch)
                pl.BlockSpec((1, tq, S), lambda b, q: (b, q, 0)),     # pos tile (bf16)
            ],
            out_specs=pl.BlockSpec((1, tq, D), lambda b, q: (b, q, 0)),
            scratch_shapes=[
                pltpu.VMEM((S, D), jnp.bfloat16),                     # K cache, lane-dense
                pltpu.VMEM((S, D), jnp.bfloat16),                     # V cache, lane-dense
            ],
        ),
        compiler_params=pltpu.CompilerParams(
            # batch axis megacore-parallel; query axis sequential (K/V cache reuse).
            dimension_semantics=("parallel", "arbitrary"),
            vmem_limit_bytes=56 * 1024 * 1024),
    )(x_bf, wq_t, bq_s, wkv, bkv, mask3, pos_bf)


# --------------------------------------------------------------------------------------
# Pure-JAX reference (mirrors the PyTorch forward, eval mode)
# --------------------------------------------------------------------------------------
def _reference(x, wq, bq, wk, bk, wv, bv, mask, pos, n_heads):
    B, S, D = x.shape
    W = D // n_heads
    q = x @ wq.T + bq
    k = x @ wk.T + bk
    v = x @ wv.T + bv

    def split(t):
        return t.reshape(B, S, n_heads, W).transpose(0, 2, 1, 3)     # (B, H, S, W)

    q, k, v = split(q), split(k), split(v)
    scores = jnp.einsum("bhsw,bhtw->bhst", q, k) / np.sqrt(W)
    scores = scores + pos[:, None, :, :]
    m = mask.astype(jnp.float32)[:, None, None, :]
    scores = scores - 10000.0 * (1.0 - m)
    scores = jax.nn.softmax(scores, axis=-1)
    h = jnp.einsum("bhst,bhtw->bhsw", scores, v)
    h = h.transpose(0, 2, 1, 3).reshape(B, S, D)
    return h


if __name__ == "__main__":
    B, S, D, H = 2, 8, 32, 4

    key = jax.random.PRNGKey(0)
    kx, kq, kk, kv, kbq, kbk, kbv, kp, km = jax.random.split(key, 9)

    x = jax.random.normal(kx, (B, S, D), dtype=jnp.float32)
    # nn.Linear-shaped parameters (W: (out, in), b: (out,))
    lim = 1.0 / math.sqrt(D)
    wq = jax.random.uniform(kq, (D, D), minval=-lim, maxval=lim, dtype=jnp.float32)
    wk = jax.random.uniform(kk, (D, D), minval=-lim, maxval=lim, dtype=jnp.float32)
    wv = jax.random.uniform(kv, (D, D), minval=-lim, maxval=lim, dtype=jnp.float32)
    bq = jax.random.uniform(kbq, (D,), minval=-lim, maxval=lim, dtype=jnp.float32)
    bk = jax.random.uniform(kbk, (D,), minval=-lim, maxval=lim, dtype=jnp.float32)
    bv = jax.random.uniform(kbv, (D,), minval=-lim, maxval=lim, dtype=jnp.float32)

    pos = 0.1 * jax.random.normal(kp, (B, S, S), dtype=jnp.float32)
    mask = (jax.random.uniform(km, (B, S)) > 0.25).astype(jnp.float32)  # 1=keep, 0=mask
    mask = mask.at[:, 0].set(1.0)  # at least one unmasked position per row

    out = mhsa_forward(x, wq, bq, wk, bk, wv, bv, mask, pos, H)
    out = jax.block_until_ready(out)

    ref = _reference(x, wq, bq, wk, bk, wv, bv, mask, pos, H)
    # bf16 matmul operands + bf16 pos/exp + approx reciprocal => relaxed tolerance
    np.testing.assert_allclose(np.asarray(out), np.asarray(ref), atol=5e-2, rtol=5e-2)

    print("KERNEL_OK")
</pallas_src>

<mosaic_0001>
module attributes {stable_mosaic.version = 11 : i64} {
  func.func @_mhsa_kernel(%arg0: i32, %arg1: i32, %arg2: memref<1x8x32xbf16, #tpu.memory_space<vmem>>, %arg3: memref<32x32xbf16, #tpu.memory_space<vmem>>, %arg4: memref<1x32xf32, #tpu.memory_space<vmem>>, %arg5: memref<32x64xbf16, #tpu.memory_space<vmem>>, %arg6: memref<1x64xf32, #tpu.memory_space<vmem>>, %arg7: memref<1x1x8xf32, #tpu.memory_space<vmem>>, %arg8: memref<1x8x8xbf16, #tpu.memory_space<vmem>>, %arg9: memref<1x8x32xf32, #tpu.memory_space<vmem>>, %arg10: memref<8x32xbf16, #tpu.memory_space<vmem>>, %arg11: memref<8x32xbf16, #tpu.memory_space<vmem>>) attributes {dimension_semantics = [#tpu.dimension_semantics<parallel>, #tpu.dimension_semantics<arbitrary>], iteration_bounds = array<i64: 2, 1>, scalar_prefetch = 0 : i64, scratch_operands = 2 : i64, tpu.core_type = #tpu.core_type<tc>, window_params = [{pipeline_mode = #tpu.pipeline_mode<synchronous>, transform_indices = @transform_0, window_bounds = array<i64: 1, 8, 32>}, {pipeline_mode = #tpu.pipeline_mode<synchronous>, transform_indices = @transform_1, window_bounds = array<i64: 32, 32>}, {pipeline_mode = #tpu.pipeline_mode<synchronous>, transform_indices = @transform_2, window_bounds = array<i64: 1, 32>}, {pipeline_mode = #tpu.pipeline_mode<synchronous>, transform_indices = @transform_3, window_bounds = array<i64: 32, 64>}, {pipeline_mode = #tpu.pipeline_mode<synchronous>, transform_indices = @transform_4, window_bounds = array<i64: 1, 64>}, {pipeline_mode = #tpu.pipeline_mode<synchronous>, transform_indices = @transform_5, window_bounds = array<i64: 1, 1, 8>}, {transform_indices = @transform_6, window_bounds = array<i64: 1, 8, 8>}, {transform_indices = @transform_7, window_bounds = array<i64: 1, 8, 32>}]} {
    %c0_i32 = arith.constant 0 : i32
    %0 = arith.cmpi eq, %arg1, %c0_i32 : i32
    %1 = arith.extui %0 : i1 to i32
    %c0_i32_0 = arith.constant 0 : i32
    %2 = arith.cmpi ne, %1, %c0_i32_0 : i32
    scf.if %2 {
      %c0_i32_55 = arith.constant 0 : i32
      %c8_i32_56 = arith.constant 8 : i32
      %109 = arith.muli %c0_i32_55, %c8_i32_56 : i32
      %110 = tpu.assume_multiple %109, 8 : i32
      %c0_57 = arith.constant 0 : index
      %111 = arith.index_cast %110 : i32 to index
      %c0_58 = arith.constant 0 : index
      %112 = vector.load %arg2[%c0_57, %111, %c0_58] : memref<1x8x32xbf16, #tpu.memory_space<vmem>>, vector<1x8x32xbf16>
      %113 = vector.shape_cast %112 : vector<1x8x32xbf16> to vector<8x32xbf16>
      %c0_59 = arith.constant 0 : index
      %c0_60 = arith.constant 0 : index
      %114 = vector.load %arg5[%c0_59, %c0_60] : memref<32x64xbf16, #tpu.memory_space<vmem>>, vector<32x64xbf16>
      %cst_61 = arith.constant dense<0.000000e+00> : vector<8x64xf32>
      %115 = tpu.matmul %113, %114, %cst_61 {dimension_numbers = #tpu.dot_dimension_numbers<[1], [0], [0], [1], [0, 0, 1, 1], [], []>} : vector<8x32xbf16>, vector<32x64xbf16>, vector<8x64xf32> -> vector<8x64xf32>
      %c0_62 = arith.constant 0 : index
      %c0_63 = arith.constant 0 : index
      %116 = vector.load %arg6[%c0_62, %c0_63] : memref<1x64xf32, #tpu.memory_space<vmem>>, vector<1x64xf32>
      %117 = vector.broadcast %116 : vector<1x64xf32> to vector<8x64xf32>
      %118 = arith.addf %115, %117 : vector<8x64xf32>
      %119 = vector.extract_strided_slice %118 {offsets = [0, 0], sizes = [8, 32], strides = [1, 1]} : vector<8x64xf32> to vector<8x32xf32>
      %120 = arith.truncf %119 : vector<8x32xf32> to vector<8x32xbf16>
      %121 = arith.index_cast %110 : i32 to index
      %c0_64 = arith.constant 0 : index
      %122 = vector.load %arg10[%121, %c0_64] : memref<8x32xbf16, #tpu.memory_space<vmem>>, vector<8x32xbf16>
      tpu.vector_store %arg10[%121, %c0_64], %120 {strides = array<i32>} : memref<8x32xbf16, #tpu.memory_space<vmem>>, vector<8x32xbf16>,
      %123 = vector.extract_strided_slice %118 {offsets = [0, 32], sizes = [8, 32], strides = [1, 1]} : vector<8x64xf32> to vector<8x32xf32>
      %124 = arith.truncf %123 : vector<8x32xf32> to vector<8x32xbf16>
      %125 = arith.index_cast %110 : i32 to index
      %c0_65 = arith.constant 0 : index
      %126 = vector.load %arg11[%125, %c0_65] : memref<8x32xbf16, #tpu.memory_space<vmem>>, vector<8x32xbf16>
      tpu.vector_store %arg11[%125, %c0_65], %124 {strides = array<i32>} : memref<8x32xbf16, #tpu.memory_space<vmem>>, vector<8x32xbf16>,
      %c1_i32 = arith.constant 1 : i32
    } else {
    }
    %c8_i32 = arith.constant 8 : i32
    %3 = arith.muli %arg1, %c8_i32 : i32
    %4 = tpu.assume_multiple %3, 8 : i32
    %c0 = arith.constant 0 : index
    %5 = arith.index_cast %4 : i32 to index
    %c0_1 = arith.constant 0 : index
    %6 = vector.load %arg2[%c0, %5, %c0_1] : memref<1x8x32xbf16, #tpu.memory_space<vmem>>, vector<1x8x32xbf16>
    %7 = vector.shape_cast %6 : vector<1x8x32xbf16> to vector<8x32xbf16>
    %c0_2 = arith.constant 0 : index
    %c0_3 = arith.constant 0 : index
    %8 = vector.load %arg3[%c0_2, %c0_3] : memref<32x32xbf16, #tpu.memory_space<vmem>>, vector<32x32xbf16>
    %cst = arith.constant dense<0.000000e+00> : vector<8x32xf32>
    %9 = tpu.matmul %7, %8, %cst {dimension_numbers = #tpu.dot_dimension_numbers<[1], [0], [0], [1], [0, 0, 1, 1], [], []>} : vector<8x32xbf16>, vector<32x32xbf16>, vector<8x32xf32> -> vector<8x32xf32>
    %c0_4 = arith.constant 0 : index
    %c0_5 = arith.constant 0 : index
    %10 = vector.load %arg4[%c0_4, %c0_5] : memref<1x32xf32, #tpu.memory_space<vmem>>, vector<1x32xf32>
    %11 = vector.broadcast %10 : vector<1x32xf32> to vector<8x32xf32>
    %12 = arith.addf %9, %11 : vector<8x32xf32>
    %13 = arith.truncf %12 : vector<8x32xf32> to vector<8x32xbf16>
    %c0_6 = arith.constant 0 : index
    %c0_7 = arith.constant 0 : index
    %c0_8 = arith.constant 0 : index
    %14 = vector.load %arg8[%c0_6, %c0_7, %c0_8] : memref<1x8x8xbf16, #tpu.memory_space<vmem>>, vector<1x8x8xbf16>
    %15 = vector.shape_cast %14 : vector<1x8x8xbf16> to vector<8x8xbf16>
    %16 = arith.extf %15 : vector<8x8xbf16> to vector<8x8xf32>
    %c0_9 = arith.constant 0 : index
    %c0_10 = arith.constant 0 : index
    %c0_11 = arith.constant 0 : index
    %17 = vector.load %arg7[%c0_9, %c0_10, %c0_11] : memref<1x1x8xf32, #tpu.memory_space<vmem>>, vector<1x1x8xf32>
    %18 = vector.shape_cast %17 : vector<1x1x8xf32> to vector<1x8xf32>
    %cst_12 = arith.constant 1.000000e+00 : f32
    %19 = vector.broadcast %cst_12 : f32 to vector<1x8xf32>
    %20 = arith.subf %19, %18 : vector<1x8xf32>
    %cst_13 = arith.constant 1.000000e+04 : f32
    %21 = vector.broadcast %cst_13 : f32 to vector<1x8xf32>
    %22 = arith.mulf %21, %20 : vector<1x8xf32>
    %23 = vector.broadcast %22 : vector<1x8xf32> to vector<8x8xf32>
    %24 = arith.subf %16, %23 : vector<8x8xf32>
    %25 = vector.extract_strided_slice %13 {offsets = [0, 0], sizes = [8, 8], strides = [1, 1]} : vector<8x32xbf16> to vector<8x8xbf16>
    %c0_14 = arith.constant 0 : index
    %c0_15 = arith.constant 0 : index
    %26 = vector.load %arg10[%c0_14, %c0_15] : memref<8x32xbf16, #tpu.memory_space<vmem>>, vector<8x8xbf16>
    %c0_16 = arith.constant 0 : index
    %c0_17 = arith.constant 0 : index
    %27 = vector.load %arg11[%c0_16, %c0_17] : memref<8x32xbf16, #tpu.memory_space<vmem>>, vector<8x8xbf16>
    "tpu.trace_start"() <{level = 10 : i32, message = "qw,kw->qk"}> : () -> ()
    %cst_18 = arith.constant dense<0.000000e+00> : vector<8x8xf32>
    %28 = tpu.matmul %25, %26, %cst_18 {dimension_numbers = #tpu.dot_dimension_numbers<[1], [1], [0], [0], [0, 0, 1, 0], [], []>} : vector<8x8xbf16>, vector<8x8xbf16>, vector<8x8xf32> -> vector<8x8xf32>
    "tpu.trace_stop"() : () -> ()
    %29 = arith.addf %28, %24 : vector<8x8xf32>
    %cst_19 = arith.constant dense<0xFF800000> : vector<8xf32>
    %30 = vector.multi_reduction <maximumf>, %29, %cst_19 [1] : vector<8x8xf32> to vector<8xf32>
    %31 = vector.shape_cast %30 : vector<8xf32> to vector<8x1xf32>
    %32 = vector.broadcast %31 : vector<8x1xf32> to vector<8x8xf32>
    %33 = arith.subf %29, %32 : vector<8x8xf32>
    %34 = math.exp %33 : vector<8x8xf32>
    %35 = arith.truncf %34 : vector<8x8xf32> to vector<8x8xbf16>
    %36 = arith.extf %35 : vector<8x8xbf16> to vector<8x8xf32>
    %cst_20 = arith.constant dense<0.000000e+00> : vector<8xf32>
    %37 = vector.multi_reduction <add>, %36, %cst_20 [1] : vector<8x8xf32> to vector<8xf32>
    %38 = vector.shape_cast %37 : vector<8xf32> to vector<8x1xf32>
    %cst_21 = arith.constant dense<0.000000e+00> : vector<8x8xf32>
    %39 = tpu.matmul %35, %27, %cst_21 {dimension_numbers = #tpu.dot_dimension_numbers<[1], [0], [0], [1], [0, 0, 1, 1], [], []>} : vector<8x8xbf16>, vector<8x8xbf16>, vector<8x8xf32> -> vector<8x8xf32>
    %40 = tpu.reciprocal %38 {approx = true} : vector<8x1xf32> -> vector<8x1xf32>
    %41 = vector.broadcast %40 : vector<8x1xf32> to vector<8x8xf32>
    %42 = arith.mulf %39, %41 : vector<8x8xf32>
    %c0_22 = arith.constant 0 : index
    %c0_23 = arith.constant 0 : index
    %c0_24 = arith.constant 0 : index
    %43 = vector.load %arg9[%c0_22, %c0_23, %c0_24] : memref<1x8x32xf32, #tpu.memory_space<vmem>>, vector<1x8x8xf32>
    %44 = vector.shape_cast %43 : vector<1x8x8xf32> to vector<8x8xf32>
    %45 = vector.shape_cast %42 : vector<8x8xf32> to vector<1x8x8xf32>
    tpu.vector_store %arg9[%c0_22, %c0_23, %c0_24], %45 {strides = array<i32>} : memref<1x8x32xf32, #tpu.memory_space<vmem>>, vector<1x8x8xf32>,
    %46 = vector.extract_strided_slice %13 {offsets = [0, 8], sizes = [8, 8], strides = [1, 1]} : vector<8x32xbf16> to vector<8x8xbf16>
    %c0_25 = arith.constant 0 : index
    %c8 = arith.constant 8 : index
    %47 = vector.load %arg10[%c0_25, %c8] : memref<8x32xbf16, #tpu.memory_space<vmem>>, vector<8x8xbf16>
    %c0_26 = arith.constant 0 : index
    %c8_27 = arith.constant 8 : index
    %48 = vector.load %arg11[%c0_26, %c8_27] : memref<8x32xbf16, #tpu.memory_space<vmem>>, vector<8x8xbf16>
    "tpu.trace_start"() <{level = 10 : i32, message = "qw,kw->qk"}> : () -> ()
    %cst_28 = arith.constant dense<0.000000e+00> : vector<8x8xf32>
    %49 = tpu.matmul %46, %47, %cst_28 {dimension_numbers = #tpu.dot_dimension_numbers<[1], [1], [0], [0], [0, 0, 1, 0], [], []>} : vector<8x8xbf16>, vector<8x8xbf16>, vector<8x8xf32> -> vector<8x8xf32>
    "tpu.trace_stop"() : () -> ()
    %50 = arith.addf %49, %24 : vector<8x8xf32>
    %cst_29 = arith.constant dense<0xFF800000> : vector<8xf32>
    %51 = vector.multi_reduction <maximumf>, %50, %cst_29 [1] : vector<8x8xf32> to vector<8xf32>
    %52 = vector.shape_cast %51 : vector<8xf32> to vector<8x1xf32>
    %53 = vector.broadcast %52 : vector<8x1xf32> to vector<8x8xf32>
    %54 = arith.subf %50, %53 : vector<8x8xf32>
    %55 = math.exp %54 : vector<8x8xf32>
    %56 = arith.truncf %55 : vector<8x8xf32> to vector<8x8xbf16>
    %57 = arith.extf %56 : vector<8x8xbf16> to vector<8x8xf32>
    %cst_30 = arith.constant dense<0.000000e+00> : vector<8xf32>
    %58 = vector.multi_reduction <add>, %57, %cst_30 [1] : vector<8x8xf32> to vector<8xf32>
    %59 = vector.shape_cast %58 : vector<8xf32> to vector<8x1xf32>
    %cst_31 = arith.constant dense<0.000000e+00> : vector<8x8xf32>
    %60 = tpu.matmul %56, %48, %cst_31 {dimension_numbers = #tpu.dot_dimension_numbers<[1], [0], [0], [1], [0, 0, 1, 1], [], []>} : vector<8x8xbf16>, vector<8x8xbf16>, vector<8x8xf32> -> vector<8x8xf32>
    %61 = tpu.reciprocal %59 {approx = true} : vector<8x1xf32> -> vector<8x1xf32>
    %62 = vector.broadcast %61 : vector<8x1xf32> to vector<8x8xf32>
    %63 = arith.mulf %60, %62 : vector<8x8xf32>
    %c0_32 = arith.constant 0 : index
    %c0_33 = arith.constant 0 : index
    %c8_34 = arith.constant 8 : index
    %64 = vector.load %arg9[%c0_32, %c0_33, %c8_34] : memref<1x8x32xf32, #tpu.memory_space<vmem>>, vector<1x8x8xf32>
    %65 = vector.shape_cast %64 : vector<1x8x8xf32> to vector<8x8xf32>
    %66 = vector.shape_cast %63 : vector<8x8xf32> to vector<1x8x8xf32>
    tpu.vector_store %arg9[%c0_32, %c0_33, %c8_34], %66 {strides = array<i32>} : memref<1x8x32xf32, #tpu.memory_space<vmem>>, vector<1x8x8xf32>,
    %67 = vector.extract_strided_slice %13 {offsets = [0, 16], sizes = [8, 8], strides = [1, 1]} : vector<8x32xbf16> to vector<8x8xbf16>
    %c0_35 = arith.constant 0 : index
    %c16 = arith.constant 16 : index
    %68 = vector.load %arg10[%c0_35, %c16] : memref<8x32xbf16, #tpu.memory_space<vmem>>, vector<8x8xbf16>
    %c0_36 = arith.constant 0 : index
    %c16_37 = arith.constant 16 : index
    %69 = vector.load %arg11[%c0_36, %c16_37] : memref<8x32xbf16, #tpu.memory_space<vmem>>, vector<8x8xbf16>
    "tpu.trace_start"() <{level = 10 : i32, message = "qw,kw->qk"}> : () -> ()
    %cst_38 = arith.constant dense<0.000000e+00> : vector<8x8xf32>
    %70 = tpu.matmul %67, %68, %cst_38 {dimension_numbers = #tpu.dot_dimension_numbers<[1], [1], [0], [0], [0, 0, 1, 0], [], []>} : vector<8x8xbf16>, vector<8x8xbf16>, vector<8x8xf32> -> vector<8x8xf32>
    "tpu.trace_stop"() : () -> ()
    %71 = arith.addf %70, %24 : vector<8x8xf32>
    %cst_39 = arith.constant dense<0xFF800000> : vector<8xf32>
    %72 = vector.multi_reduction <maximumf>, %71, %cst_39 [1] : vector<8x8xf32> to vector<8xf32>
    %73 = vector.shape_cast %72 : vector<8xf32> to vector<8x1xf32>
    %74 = vector.broadcast %73 : vector<8x1xf32> to vector<8x8xf32>
    %75 = arith.subf %71, %74 : vector<8x8xf32>
    %76 = math.exp %75 : vector<8x8xf32>
    %77 = arith.truncf %76 : vector<8x8xf32> to vector<8x8xbf16>
    %78 = arith.extf %77 : vector<8x8xbf16> to vector<8x8xf32>
    %cst_40 = arith.constant dense<0.000000e+00> : vector<8xf32>
    %79 = vector.multi_reduction <add>, %78, %cst_40 [1] : vector<8x8xf32> to vector<8xf32>
    %80 = vector.shape_cast %79 : vector<8xf32> to vector<8x1xf32>
    %cst_41 = arith.constant dense<0.000000e+00> : vector<8x8xf32>
    %81 = tpu.matmul %77, %69, %cst_41 {dimension_numbers = #tpu.dot_dimension_numbers<[1], [0], [0], [1], [0, 0, 1, 1], [], []>} : vector<8x8xbf16>, vector<8x8xbf16>, vector<8x8xf32> -> vector<8x8xf32>
    %82 = tpu.reciprocal %80 {approx = true} : vector<8x1xf32> -> vector<8x1xf32>
    %83 = vector.broadcast %82 : vector<8x1xf32> to vector<8x8xf32>
    %84 = arith.mulf %81, %83 : vector<8x8xf32>
    %c0_42 = arith.constant 0 : index
    %c0_43 = arith.constant 0 : index
    %c16_44 = arith.constant 16 : index
    %85 = vector.load %arg9[%c0_42, %c0_43, %c16_44] : memref<1x8x32xf32, #tpu.memory_space<vmem>>, vector<1x8x8xf32>
    %86 = vector.shape_cast %85 : vector<1x8x8xf32> to vector<8x8xf32>
    %87 = vector.shape_cast %84 : vector<8x8xf32> to vector<1x8x8xf32>
    tpu.vector_store %arg9[%c0_42, %c0_43, %c16_44], %87 {strides = array<i32>} : memref<1x8x32xf32, #tpu.memory_space<vmem>>, vector<1x8x8xf32>,
    %88 = vector.extract_strided_slice %13 {offsets = [0, 24], sizes = [8, 8], strides = [1, 1]} : vector<8x32xbf16> to vector<8x8xbf16>
    %c0_45 = arith.constant 0 : index
    %c24 = arith.constant 24 : index
    %89 = vector.load %arg10[%c0_45, %c24] : memref<8x32xbf16, #tpu.memory_space<vmem>>, vector<8x8xbf16>
    %c0_46 = arith.constant 0 : index
    %c24_47 = arith.constant 24 : index
    %90 = vector.load %arg11[%c0_46, %c24_47] : memref<8x32xbf16, #tpu.memory_space<vmem>>, vector<8x8xbf16>
    "tpu.trace_start"() <{level = 10 : i32, message = "qw,kw->qk"}> : () -> ()
    %cst_48 = arith.constant dense<0.000000e+00> : vector<8x8xf32>
    %91 = tpu.matmul %88, %89, %cst_48 {dimension_numbers = #tpu.dot_dimension_numbers<[1], [1], [0], [0], [0, 0, 1, 0], [], []>} : vector<8x8xbf16>, vector<8x8xbf16>, vector<8x8xf32> -> vector<8x8xf32>
    "tpu.trace_stop"() : () -> ()
    %92 = arith.addf %91, %24 : vector<8x8xf32>
    %cst_49 = arith.constant dense<0xFF800000> : vector<8xf32>
    %93 = vector.multi_reduction <maximumf>, %92, %cst_49 [1] : vector<8x8xf32> to vector<8xf32>
    %94 = vector.shape_cast %93 : vector<8xf32> to vector<8x1xf32>
    %95 = vector.broadcast %94 : vector<8x1xf32> to vector<8x8xf32>
    %96 = arith.subf %92, %95 : vector<8x8xf32>
    %97 = math.exp %96 : vector<8x8xf32>
    %98 = arith.truncf %97 : vector<8x8xf32> to vector<8x8xbf16>
    %99 = arith.extf %98 : vector<8x8xbf16> to vector<8x8xf32>
    %cst_50 = arith.constant dense<0.000000e+00> : vector<8xf32>
    %100 = vector.multi_reduction <add>, %99, %cst_50 [1] : vector<8x8xf32> to vector<8xf32>
    %101 = vector.shape_cast %100 : vector<8xf32> to vector<8x1xf32>
    %cst_51 = arith.constant dense<0.000000e+00> : vector<8x8xf32>
    %102 = tpu.matmul %98, %90, %cst_51 {dimension_numbers = #tpu.dot_dimension_numbers<[1], [0], [0], [1], [0, 0, 1, 1], [], []>} : vector<8x8xbf16>, vector<8x8xbf16>, vector<8x8xf32> -> vector<8x8xf32>
    %103 = tpu.reciprocal %101 {approx = true} : vector<8x1xf32> -> vector<8x1xf32>
    %104 = vector.broadcast %103 : vector<8x1xf32> to vector<8x8xf32>
    %105 = arith.mulf %102, %104 : vector<8x8xf32>
    %c0_52 = arith.constant 0 : index
    %c0_53 = arith.constant 0 : index
    %c24_54 = arith.constant 24 : index
    %106 = vector.load %arg9[%c0_52, %c0_53, %c24_54] : memref<1x8x32xf32, #tpu.memory_space<vmem>>, vector<1x8x8xf32>
    %107 = vector.shape_cast %106 : vector<1x8x8xf32> to vector<8x8xf32>
    %108 = vector.shape_cast %105 : vector<8x8xf32> to vector<1x8x8xf32>
    tpu.vector_store %arg9[%c0_52, %c0_53, %c24_54], %108 {strides = array<i32>} : memref<1x8x32xf32, #tpu.memory_space<vmem>>, vector<1x8x8xf32>,
    return
  }
  func.func @transform_0(%arg0: i32, %arg1: i32) -> (i32, i32, i32) {
    %c0_i32 = arith.constant 0 : i32
    %c0_i32_0 = arith.constant 0 : i32
    %c0_i32_1 = arith.constant 0 : i32
    return %arg0, %c0_i32, %c0_i32_0 : i32, i32, i32
  }
  func.func @transform_1(%arg0: i32, %arg1: i32) -> (i32, i32) {
    %c0_i32 = arith.constant 0 : i32
    %c0_i32_0 = arith.constant 0 : i32
    %c0_i32_1 = arith.constant 0 : i32
    return %c0_i32, %c0_i32_0 : i32, i32
  }
  func.func @transform_2(%arg0: i32, %arg1: i32) -> (i32, i32) {
    %c0_i32 = arith.constant 0 : i32
    %c0_i32_0 = arith.constant 0 : i32
    %c0_i32_1 = arith.constant 0 : i32
    return %c0_i32, %c0_i32_0 : i32, i32
  }
  func.func @transform_3(%arg0: i32, %arg1: i32) -> (i32, i32) {
    %c0_i32 = arith.constant 0 : i32
    %c0_i32_0 = arith.constant 0 : i32
    %c0_i32_1 = arith.constant 0 : i32
    return %c0_i32, %c0_i32_0 : i32, i32
  }
  func.func @transform_4(%arg0: i32, %arg1: i32) -> (i32, i32) {
    %c0_i32 = arith.constant 0 : i32
    %c0_i32_0 = arith.constant 0 : i32
    %c0_i32_1 = arith.constant 0 : i32
    return %c0_i32, %c0_i32_0 : i32, i32
  }
  func.func @transform_5(%arg0: i32, %arg1: i32) -> (i32, i32, i32) {
    %c0_i32 = arith.constant 0 : i32
    %c0_i32_0 = arith.constant 0 : i32
    %c0_i32_1 = arith.constant 0 : i32
    return %arg0, %c0_i32, %c0_i32_0 : i32, i32, i32
  }
  func.func @transform_6(%arg0: i32, %arg1: i32) -> (i32, i32, i32) {
    %c0_i32 = arith.constant 0 : i32
    %c0_i32_0 = arith.constant 0 : i32
    return %arg0, %arg1, %c0_i32 : i32, i32, i32
  }
  func.func @transform_7(%arg0: i32, %arg1: i32) -> (i32, i32, i32) {
    %c0_i32 = arith.constant 0 : i32
    %c0_i32_0 = arith.constant 0 : i32
    return %arg0, %arg1, %c0_i32 : i32, i32, i32
  }
}

</mosaic_0001>

<bundles_post_ra>
// kernel: tpu_custom_call.1
= control target key start
LH: loop header
LB: loop body
LE: loop exit
PB: predicated region body
PF: predicated region fallthrough
CT: control target
= control target key end

     0   :  { %s1647_s0 = inlined_call_operand.hbm [shape: bf16[2,8,32], index: 0, kind: input, shape index: {}]   ;;  %s1648_s1 = inlined_call_operand.hbm [shape: bf16[32,32], index: 1, kind: input, shape index: {}]   ;;  %s1649_s2 = inlined_call_operand.vmem [shape: f32[1,32], index: 2, kind: input, shape index: {}]   ;;  %s1650_s3 = inlined_call_operand.hbm [shape: bf16[32,64], index: 3, kind: input, shape index: {}]   ;;  %s1651_s4 = inlined_call_operand.hbm [shape: f32[1,64], index: 4, kind: input, shape index: {}]   ;;  %s1652_s5 = inlined_call_operand.vmem [shape: f32[2,1,8], index: 5, kind: input, shape index: {}]   ;;  %s1653_s6 = inlined_call_operand.hbm [shape: bf16[2,8,8], index: 6, kind: input, shape index: {}]   ;;  %s1654_s7 = inlined_call_operand.hbm [shape: f32[2,8,32], index: 7, kind: output, shape index: {}]  }
   0x1   :  { %1659 = sst [smem:[#allocation21_spill]] %s1647_s0 }
   0x2   :  { %1660 = sst [smem:[#allocation22_spill]] %s1654_s7 }
   0x3   :  { %12 = vsyncpa [#allocation5], 0 }
   0x4   :  { %13 = vsyncpa [#allocation8], 0 }
   0x5   :  { %14 = vsyncpa [#allocation11], 0 }
   0x6   :  { %15 = vsyncpa [#allocation6], 0 }
   0x7   :  { %17 = vsyncpa [#allocation6 + $0x1], 0  ;;  %s1396_s24 = smov 0   ;;  %s1398_s25 = smov 0  }
   0x8   :  { %s1400_s26 = smov 0   ;;  %s1402_s27 = smov 0  }
   0x9   :  { %s1404_s28 = smov 0   ;;  %s1406_s29 = smov 0  }
   0xa LB: > { %1661 = sst [smem:[#allocation19_spill]] %s1321_s24  ;;  %s1427_s30 = sadd.s32 4294967295, %s1341_s29   ;;  %s1341_s29 = sphi %s1406_s29, %s23_s29   ;;  %s1337_s28 = sphi %s1404_s28, %s1684_s28   ;;  %s1333_s27 = sphi %s1402_s27, %s1683_s27   ;;  %s1329_s26 = sphi %s1400_s26, %s1682_s26   ;;  %s1325_s25 = sphi %s1398_s25, %s1681_s25   ;;  %s1321_s24 = sphi %s1396_s24, %s1680_s24  }
   0xb   : > { %s922_s8 = sadd.s32 4294967294, %s1341_s29   ;;  %p55_p0 = scmp.ne.s32.totalorder %s1325_s25, %s1321_s24 }
   0xc   : > { %p1658_p1 = scmp.eq.s32.totalorder %s1427_s30, 0  ;;  %p187_p2 = scmp.ne.s32.totalorder %s1329_s26, %s1325_s25 }
   0xd   : > { %p188_p3 = scmp.eq.s32.totalorder %s1341_s29, 0  ;;  %p219_p5 = scmp.eq.s32.totalorder %s1427_s30, 1 }
   0xe   : > { %p1438_p4 = por %p1658_p1, %p55_p0  ;;  %p225_p7 = scmp.eq.s32.totalorder %s922_s8, 1 }
   0xf   : > { %p1443_p6 = por %p188_p3, %p187_p2  ;;  %p1447_p8 = por %p219_p5, %p187_p2 }
  0x10   : > { %p923_p9 = scmp.ge.s32.totalorder %s1341_s29, 1  ;;  %p1452_p10 = por %p225_p7, %p55_p0 }
  0x11   : > { %p232_p11 = scmp.lt.s32.totalorder %s1341_s29, 3  ;;  %s924_s13 = sshll.u32 %s1333_s27, 2 }
  0x12   : > { %s1665_s12 = scalar_select %p1452_p10, 1, 0 }
  0x13   : > { %p1458_p12 = pnand %p923_p9, %p232_p11  ;;  %s1668_s0 = sld [smem:[#allocation21_spill]] }
  0x14   : > { %1666 = sst [smem:[#allocation20_spill]] %s1665_s12  ;;  %s1343_s19 = smov [#allocation4]  }
  0x15   : > { %s248_s20 = sshll.u32 %s1343_s19, 4  ;;  %p989_p13 = pneg %p1458_p12  ;;  %s249_s20 = int_to_ptr.vmem [resolvable:$true] %s248_s20 }
  0x17   : > { %p1469_p0 = pnand %p989_p13, %p1438_p4  ;;  %p1475_p2 = pnand %p989_p13, %p1658_p1 }
  0x19   : > { %s244_s17 = scalar_lea.hbm %s1668_s0, %s924_s13  ;;  %s257_s13 = sshll.u32 %s1648_s1, 4  ;;  %s258_s13 = int_to_ptr.hbm [resolvable:$true] %s257_s13 }
  0x1a   : > { %s246_s18 = sshll.u32 %s244_s17, 4  ;;  %p1101_p7 = pneg %p1469_p0  ;;  %s247_s18 = int_to_ptr.hbm [resolvable:$true] %s246_s18 }
  0x1b   : > { %s1097_s15 = sshra.s32 %s247_s18, 4  ;;  %s1104_s12 = scalar_lea.hbm %s1668_s0, 8  ;;  %s1098_s15 = int_to_ptr.hbm [resolvable:$true] %s1097_s15 }
  0x1c   : > { %s1099_s16 = scalar_lea.hbm %s1098_s15, 4  ;;  %p1105_p13 = scmp.lt.s32.totalorder %s1098_s15, %s1668_s0 }
  0x1d   : > { %p1100_p5 = scmp.ne.s32.totalorder %s1098_s15, %s1099_s16  ;;  %p1106_p3 = scmp.lt.s32.totalorder %s1104_s12, %s1099_s16 }
  0x1f   : > { %p1102_p9 = pnand %p1101_p7, %p1100_p5  ;;  %p1107_p1 = por %p1106_p3, %p1105_p13 }
  0x21   : > { %p1103_p11 = pneg %p1102_p9 }
  0x23   : > { %p1108_p10 = pnand %p1107_p1, %p1103_p11 }
  0x25   : > { %1111 = shalt.err (!%p1108_p10)
}
  0x26   : > { %992 = dma.hbm_to_vmem [thread:$0]  (!%p1469_p0), %s247_s18, 64, %s249_s20, [#allocation5]  }
  0x27   : > { %s1344_s23 = smov [#allocation7]   ;;  %s1345_s17 = smov 64  }
  0x28   : > { %s259_s8 = sshll.u32 %s1344_s23, 4  ;;  %s1346_s19 = smov 4   ;;  %s260_s8 = int_to_ptr.vmem [resolvable:$true] %s259_s8 }
  0x29   : > { %995 = dma.hbm_to_vmem [thread:$0]  (!%p1475_p2), %s258_s13, 256, %s260_s8, [#allocation8], %s1345_s17, %s1345_s17, %s1346_s19  }
  0x2a   : > { %s274_s12 = sshll.u32 %s1650_s3, 4  ;;  %s1347_s18 = smov [#allocation9]   ;;  %s275_s12 = int_to_ptr.hbm [resolvable:$true] %s274_s12 }
  0x2b   : > { %s276_s20 = sshll.u32 %s1347_s18, 4  ;;  %s289_s16 = sshll.u32 %s1651_s4, 4  ;;  %s277_s20 = int_to_ptr.vmem [resolvable:$true] %s276_s20  ;;  %s290_s16 = int_to_ptr.hbm [resolvable:$true] %s289_s16 }
  0x2c   : > { %998 = dma.hbm_to_vmem [thread:$0]  (!%p1475_p2), %s275_s12, 256, %s277_s20, [#allocation8], %s1345_s17, %s1345_s17, %s1346_s19  }
  0x2d   : > { %s1348_s13 = smov [#allocation10]   ;;  %s35_s8 = sadd.s32 1, %s1337_s28 }
  0x2e   : > { %s291_s23 = sshll.u32 %s1348_s13, 4  ;;  %s42_s7 = sadd.s32 1, %s1329_s26  ;;  %s292_s23 = int_to_ptr.vmem [resolvable:$true] %s291_s23 }
  0x2f   : > { %1001 = dma.hbm_to_vmem [thread:$0]  (!%p1475_p2), %s290_s16, 16, %s292_s23, [#allocation11]  }
  0x30   : > { %p37_p1 = scmp.ge.s32.totalorder %s35_s8, 2  ;;  %p1013_p10 = scmp.lt.s32.totalorder %s1341_s29, 2 }
  0x31   : > { %s308_s24 = sand.u32 1, %s1341_s29   ;;  %s310_s18 = sand.u32 1, %s1329_s26  }
  0x32   : > { %s1686_s8 = smov (%p37_p1, %s35_s8), 0  ;;  %s929_s17 = sshll.u32 %s310_s18, 2 }
  0x33   : > { %s39_s19 = ssub.s32 %s1337_s28, %s1686_s8  ;;  %s930_s12 = sshll.u32 %s1337_s28, 2 }
  0x34   : > { %p40_p0 = scmp.eq.s32.totalorder %s39_s19, 0  ;;  %s317_s22 = scalar_lea.hbm %s1653_s6, %s930_s12 }
  0x35   : > { %s312_s15 = scalar_lea.vmem [#allocation12], %s929_s17  ;;  %s319_s23 = sshll.u32 %s317_s22, 4  ;;  %s320_s23 = int_to_ptr.hbm [resolvable:$true] %s319_s23 }
  0x36   : > { %s321_s16 = sshll.u32 %s312_s15, 4  ;;  %p1003_p2 = pnand %p1013_p10, %p1443_p6  ;;  %s322_s16 = int_to_ptr.vmem [resolvable:$true] %s321_s16 }
  0x37   : > { %s1519_s13 = scalar_select %p40_p0, %s1329_s26, %s42_s7  }
  0x38   : > { %s309_s0 = scalar_lea.sflag [#allocation5], %s308_s24  ;;  %330 = sbr.rel (%p1458_p12) target bundleno = 1050 (0x41a), region = 48 }
  0x39   : > { %1005 = dma.hbm_to_vmem [thread:$0]  (!%p1003_p2), %s320_s23, 64, %s322_s16, %s309_s0  }
  0x3d   : > { %1300 = dma.done.wait (%p1438_p4), [#allocation5], 64  }
  0x3e   : > { %1302 = vsyncadd (%p1438_p4), [#allocation5], 4294967232  ;;  %p1671_p3 = scmp.eq.s32.totalorder %s1427_s30, 0 }
  0x40   : > { %1304 = dma.done.wait (%p1671_p3), [#allocation8], 512   ;;  %p1672_p5 = pmov %p1671_p3 }
  0x41   : > { %p1673_p7 = pmov %p1671_p3 }
  0x42   : > { %1306 = vsyncadd (%p1672_p5), [#allocation8], 4294966784 }
  0x43   : > { %1308 = dma.done.wait (%p1673_p7), [#allocation11], 16   ;;  %p1674_p6 = pmov %p1671_p3 }
  0x44   : > { %s352_s0 = sand.u32 1, %s1427_s30   ;;  %s1541_s10 = sand.u32 1, %s1325_s25  }
  0x45   : > { %1310 = vsyncadd (%p1674_p6), [#allocation11], 4294967280  ;;  %s935_s14 = sshll.u32 %s1541_s10, 2  ;;  %s353_s7 = scalar_lea.sflag [#allocation5], %s352_s0 }
  0x46   : > { %s1544_s24 = scalar_lea.vmem [#allocation12], %s935_s14 }
  0x47   : > { %1312 = dma.done.wait (%p1438_p4), %s353_s7, 64  }
  0x48   : > { %1314 = vsyncadd (%p1438_p4), %s353_s7, 4294967232  ;;  %v968_v0 = vld [vmem:[#allocation9 + $0x8] sm:$0xff]  ;;  %v970_v1 = vld [vmem:[#allocation7 + $0x8] sm:$0xff]  ;;  %vm420_vm0 = vcmask 261120   ;;  %vm438_vm1 = vcmask 257024   ;;  %vm500_vm2 = vcmask 64512  }
  0x49   : > { %430 = vmatpush.bf16.msra.mxu0 %v968_v0  ;;  %v967_v2 = vld [vmem:[#allocation9] sm:$0xff]  ;;  %481 = vmatpush.bf16.msra.mxu1 %v970_v1  ;;  %v969_v3 = vld [vmem:[#allocation7] sm:$0xff]  ;;  %v399_v4 = vld [vmem:[#allocation4] sm:$0xf]  ;;  %s1349_s18 = smov 112   ;;  %s1350_s17 = smov 120  }
  0x4a   : > { %v450_v5 = vld [vmem:[#allocation4] sm:$0xf]  ;;  %v1079_v6 = vld [vmem:[#allocation10] ss:$0 sm:$0xff]  ;;  %v1080_v11 = vld [vmem:[%s1649_s2] ss:$0 sm:$0xff] }
  0x4b   : > { %s1351_s19 = smov 104   ;;  %p391_p4 = scmp.lt.s32.totalorder %s1333_s27, 1  ;;  %v489_v36 = vld [vmem:[%s1544_s24] sm:$0xf]  ;;  %vm534_vm3 = vcmask 1043456   ;;  %vm626_vm4 = vcmask 130112  }
  0x4c   : > { %v490_v37 = vunpack.c.l.bf16 %v489_v36  ;;  %s1352_s15 = smov 96   ;;  %s1353_s16 = smov 16   ;;  %vm697_vm5 = vcmask 195712   ;;  %vm768_vm6 = vcmask 261312  }
  0x4d   : > { %431 = vmatpush.bf16.msra.mxu0 %v967_v2  ;;  %482 = vmatpush.bf16.msra.mxu1 %v969_v3  ;;  %s392_s12 = scalar_select %p391_p4, %s1333_s27, 1 }
  0x4e   : > { %s936_s23 = sshll.u32 %s1541_s10, 3  ;;  %s1354_s14 = smov 8  }
  0x4f   : > { %s393_s22 = scalar_lea.vmem %s1652_s5, %s392_s12  ;;  %s1601_s0 = scalar_lea.vmem [#allocation13], %s936_s23 }
  0x50   : > { %945 = vmatmul.msk.bf16.vlgmr.msra.gmra.mxu0 %vm420_vm0, %v399_v4  ;;  %954 = vmatmul.msk.bf16.vlgmr.msra.gmra.mxu1 %vm420_vm0, %v450_v5  ;;  %v491_v32 = vld [vmem:[%s393_s22] sm:$0x1]  ;;  %s1355_s7 = smov 24   ;;  %s964_s24 = sshll.u32 %s1333_s27, 3 }
  0x51   : > { %v492_v33 = vsub.f32 1.0, %v491_v32  ;;  %s771_s20 = scalar_lea.sflag [#allocation6], %s1541_s10 }
  0x53   : > { %v493_v35 = vmul.f32 10000.0, %v492_v33 }
  0x55   : > { %v495_v38 = vperm.slane %v493_v35, 0 }
  0x57   : > { %v1570_v40 = vsub.f32 %v490_v37, %v495_v38 }
  0xcd   : > { %v433_v7 = vpop.f32.mrf.mxu0  ;;  %v484_v9 = vpop.f32.mrf.mxu1 }
  0xce   : > { %v434_v8 = vadd.f32 %v1079_v6, %v433_v7  ;;  %v485_v13 = vadd.f32 %v1080_v11, %v484_v9 }
  0xd0   : > { %v437_v10 = vpack.c.bf16 %v434_v8, %v434_v8  ;;  %v488_v18 = vpack.c.bf16 %v485_v13, %v485_v13 }
  0xd2   : > { %439 = vst.msk [vmem:[#allocation2] sm:$0xf] %vm438_vm1, %v437_v10  ;;  %v557_v25 = vunpack.c.l.b16 %v488_v18 }
  0xd4   : > { %v558_v27 = vpack.c.b16 %v557_v25, %v557_v25 }
  0xd5   : > { %v435_v12 = vpop.f32.mrf.mxu0  ;;  %v486_v14 = vpop.f32.mrf.mxu1 }
  0xd9   : > { %v498_v15 = vld [vmem:[#allocation2] sm:$0xf] }
  0xda   : > { %v628_v16 = vld [vmem:[#allocation2] sm:$0xf]  ;;  %v505_v19 = vsel %vm500_vm2, %v498_v15, 0 }
  0xdb   : > { %v554_v17 = vld [vmem:[#allocation2] sm:$0xf]  ;;  %v633_v20 = vunpack.c.l.b16 %v628_v16  ;;  %514 = vmatpush.bf16.xpose.msra.mxu2 %v505_v19 }
  0xdc   : > { %v562_v21 = vunpack.c.l.b16 %v554_v17  ;;  %v699_v24 = vld [vmem:[#allocation2] sm:$0xf] }
  0xdd   : > { %v634_v22 = vpack.c.b16 %v633_v20, %v633_v20  ;;  %v704_v26 = vunpack.c.l.b16 %v699_v24 }
  0xde   : > { %v563_v23 = vpack.c.b16 %v562_v21, %v562_v21 }
  0xdf   : > { %635 = vrot.lane.b32.xlu2 %v634_v22, %s1349_s18  ;;  %v705_v28 = vpack.c.b16 %v704_v26, %v704_v26 }
  0xe0   : > { %564 = vrot.lane.b32.xlu1 %v563_v23, %s1350_s17 }
  0xe2   : > { %955 = vmatmul.msk.bf16.vlgmr.msra.gmra.mxu2 %vm500_vm2, %v488_v18 }
  0xe7   : > { %706 = vrot.lane.b32.xlu2 %v705_v28, %s1351_s19 }
  0xe8   : > { %559 = vrot.lane.b32.xlu1 %v558_v27, %s1350_s17 }
  0xef   : > { %701 = vrot.lane.b32.xlu2 %v558_v27, %s1351_s19 }
  0xf0   : > { %630 = vrot.lane.b32.xlu1 %v558_v27, %s1349_s18 }
 0x139   : > { %v636_v29 = vpop.permute.xlu2 %635 }
 0x13a   : > { %v641_v30 = vsel %vm500_vm2, %v636_v29, 0 }
 0x13b   : > { %650 = vmatpush.bf16.xpose.msrb.mxu1 %v641_v30 }
 0x141   : > { %v707_v61 = vpop.permute.xlu2 %706 }
 0x142   : > { %v712_v1 = vsel %vm500_vm2, %v707_v61, 0 }
 0x149   : > { %v702_v2 = vpop.permute.xlu2 %701 }
 0x152   : > { %v565_v31 = vpop.permute.xlu1 %564 }
 0x153   : > { %v570_v60 = vsel %vm500_vm2, %v565_v31, 0 }
 0x15a   : > { %v560_v34 = vpop.permute.xlu1 %559 }
 0x162   : > { %v631_v39 = vpop.permute.xlu1 %630 }
 0x163   : > { %959 = vmatmul.msk.bf16.vlgmr.msrb.gmra.mxu1 %vm500_vm2, %v631_v39 }
 0x165   : > { %v516_v41 = vpop.f32.mrf.mxu2 }
 0x166   : > { %v517_v42 = vadd.f32 %v516_v41, %v1570_v40 }
 0x168   : > { %v520_v43 = vsel %vm500_vm2, %v517_v42, -inf }
 0x169   : > { %521 = vmax.xlane.f32.xlu0 %v520_v43 }
 0x16d   : > { %v518_v44 = vpop.f32.mrf.mxu2 }
 0x17d   : > { %441 = vrot.lane.b32.xlu0 %v437_v10, %s1352_s15 }
 0x1dc   : > { %v522_v49 = vpop.xlane.xlu0 %521 }
 0x1dd   : > { %v523_v50 = vsub.f32 %v517_v42, %v522_v49 }
 0x1df   : > { %v524_v51 = vmul.f32 1.442695, %v523_v50 }
 0x1e0   : > { %v652_v45 = vpop.f32.mrf.mxu1 }
 0x1e1   : > { %v653_v46 = vadd.f32 %v652_v45, %v1570_v40  ;;  %1081 = vpow2.f32 %v524_v51 }
 0x1e3   : > { %v656_v47 = vsel %vm500_vm2, %v653_v46, -inf }
 0x1e4   : > { %657 = vmax.xlane.f32.xlu2 %v656_v47 }
 0x1e7   : > { %v1082_v56 = vpop.eup %1081 }
 0x1e8   : > { %v654_v48 = vpop.f32.mrf.mxu1  ;;  %v526_v0 = vpack.c.bf16 %v1082_v56, %v1082_v56 }
 0x1ea   : > { %v527_v27 = vunpack.c.l.bf16 %v526_v0 }
 0x1ec   : > { %v528_v28 = vsel %vm500_vm2, %v527_v27, 0.0 }
 0x1ef   : > { %v442_v52 = vpop.permute.xlu0 %441 }
 0x1f0   : > { %444 = vst.msk [vmem:[#allocation3] sm:$0xf] %vm438_vm1, %v442_v52 }
 0x1f7   : > { %v499_v53 = vld [vmem:[#allocation3] sm:$0xf] }
 0x1f8   : > { %v629_v54 = vld [vmem:[#allocation3] sm:$0xf]  ;;  %v536_v57 = vsel %vm534_vm3, %v499_v53, 0 }
 0x1f9   : > { %v555_v55 = vld [vmem:[#allocation3] sm:$0xf]  ;;  %v668_v58 = vunpack.c.l.b16 %v629_v54  ;;  %545 = vmatpush.bf16.msra.mxu3 %v536_v57 }
 0x1fa   : > { %v597_v59 = vunpack.c.l.b16 %v555_v55  ;;  %v700_v21 = vld [vmem:[#allocation3] sm:$0xf] }
 0x1fb   : > { %v669_v62 = vpack.c.b16 %v668_v58, %v668_v58  ;;  %v739_v23 = vunpack.c.l.b16 %v700_v21 }
 0x1fc   : > { %v598_v63 = vpack.c.b16 %v597_v59, %v597_v59  ;;  %956 = vmatmul.msk.bf16.vlgmr.msra.gmra.mxu3 %vm500_vm2, %v526_v0 }
 0x1fd   : > { %579 = vmatpush.bf16.xpose.msrb.mxu3 %v570_v60  ;;  %670 = vrot.lane.b32.xlu2 %v669_v62, %s1349_s18  ;;  %v740_v26 = vpack.c.b16 %v739_v23, %v739_v23  ;;  %s1675_s18 = sld [smem:[#allocation22_spill]] }
 0x1fe   : > { %599 = vrot.lane.b32.xlu0 %v598_v63, %s1350_s17 }
 0x203   : > { %s782_s17 = scalar_lea.hbm %s1675_s18, %s964_s24 }
 0x204   : > { %s786_s12 = sshll.u32 %s782_s17, 4  ;;  %s787_s12 = int_to_ptr.hbm [resolvable:$true] %s786_s12 }
 0x205   : > { %721 = vmatpush.bf16.xpose.msra.mxu3 %v712_v1  ;;  %s1261_s21 = sshra.s32 %s787_s12, 4  ;;  %s1262_s21 = int_to_ptr.hbm [resolvable:$true] %s1261_s21 }
 0x206   : > { %s1263_s22 = scalar_lea.hbm %s1262_s21, 8  ;;  %p1268_p13 = scmp.lt.s32.totalorder %s1262_s21, %s1675_s18 }
 0x207   : > { %p1264_p12 = scmp.ne.s32.totalorder %s1262_s21, %s1263_s22 }
 0x209   : > { %p1265_p9 = pnand %p1264_p12, %p1447_p8 }
 0x20b   : > { %p1266_p11 = pneg %p1265_p9 }
 0x20c   : > { %957 = vmatmul.msk.bf16.vlgmr.msrb.gmra.mxu3 %vm500_vm2, %v560_v34 }
 0x21c   : > { %961 = vmatmul.msk.bf16.vlgmr.msra.gmra.mxu3 %vm500_vm2, %v702_v2 }
 0x257   : > { %v658_v3 = vpop.xlane.xlu2 %657 }
 0x258   : > { %v659_v4 = vsub.f32 %v653_v46, %v658_v3 }
 0x25a   : > { %v660_v5 = vmul.f32 1.442695, %v659_v4 }
 0x25c   : > { %1083 = vpow2.f32 %v660_v5 }
 0x25f   : > { %v671_v6 = vpop.permute.xlu2 %670 }
 0x260   : > { %v676_v7 = vsel %vm534_vm3, %v671_v6, 0 }
 0x261   : > { %685 = vmatpush.bf16.msrb.mxu2 %v676_v7 }
 0x262   : > { %v1084_v8 = vpop.eup %1083 }
 0x263   : > { %v662_v9 = vpack.c.bf16 %v1084_v8, %v1084_v8 }
 0x265   : > { %960 = vmatmul.msk.bf16.vlgmr.msrb.gmra.mxu2 %vm500_vm2, %v662_v9  ;;  %v663_v22 = vunpack.c.l.bf16 %v662_v9 }
 0x267   : > { %v664_v25 = vsel %vm500_vm2, %v663_v22, 0.0 }
 0x270   : > { %v600_v10 = vpop.permute.xlu0 %599 }
 0x271   : > { %v605_v11 = vsel %vm534_vm3, %v600_v10, 0 }
 0x272   : > { %614 = vmatpush.bf16.msrb.mxu0 %v605_v11 }
 0x27f   : > { %v547_v12 = vpop.f32.mrf.mxu3 }
 0x287   : > { %v549_v13 = vpop.f32.mrf.mxu3 }
 0x28f   : > { %v581_v14 = vpop.f32.mrf.mxu3 }
 0x290   : > { %v582_v15 = vadd.f32 %v581_v14, %v1570_v40 }
 0x292   : > { %v585_v16 = vsel %vm500_vm2, %v582_v15, -inf }
 0x293   : > { %586 = vmax.xlane.f32.xlu1 %v585_v16 }
 0x297   : > { %v583_v17 = vpop.f32.mrf.mxu3 }
 0x29f   : > { %v723_v18 = vpop.f32.mrf.mxu3 }
 0x2a0   : > { %v724_v19 = vadd.f32 %v723_v18, %v1570_v40 }
 0x2a2   : > { %v727_v20 = vsel %vm500_vm2, %v724_v19, -inf }
 0x2a3   : > { %728 = vmax.xlane.f32.xlu0 %v727_v20 }
 0x2a7   : > { %v725_v24 = vpop.f32.mrf.mxu3 }
 0x2ab   : > { %665 = vadd.xlane.f32.xlu0 %v664_v25 }
 0x2ac   : > { %741 = vrot.lane.b32.xlu1 %v740_v26, %s1351_s19  ;;  %s784_s19 = sshll.u32 %s1601_s0, 4  ;;  %s785_s19 = int_to_ptr.vmem [resolvable:$true] %s784_s19 }
 0x2d6   : > { %529 = vadd.xlane.f32.xlu1 %v528_v28 }
 0x2e8   : > { %v687_v29 = vpop.f32.mrf.mxu2 }
 0x2f0   : > { %v689_v30 = vpop.f32.mrf.mxu2 }
 0x306   : > { %v587_v31 = vpop.xlane.xlu1 %586 }
 0x307   : > { %v588_v32 = vsub.f32 %v582_v15, %v587_v31 }
 0x309   : > { %v589_v33 = vmul.f32 1.442695, %v588_v32 }
 0x30b   : > { %1085 = vpow2.f32 %v589_v33 }
 0x311   : > { %v1086_v34 = vpop.eup %1085 }
 0x312   : > { %v591_v35 = vpack.c.bf16 %v1086_v34, %v1086_v34 }
 0x314   : > { %958 = vmatmul.msk.bf16.vlgmr.msrb.gmra.mxu0 %vm500_vm2, %v591_v35  ;;  %v592_v36 = vunpack.c.l.bf16 %v591_v35 }
 0x316   : > { %v729_v37 = vpop.xlane.xlu0 %728  ;;  %v593_v38 = vsel %vm500_vm2, %v592_v36, 0.0 }
 0x317   : > { %v730_v39 = vsub.f32 %v724_v19, %v729_v37  ;;  %594 = vadd.xlane.f32.xlu0 %v593_v38 }
 0x319   : > { %v731_v40 = vmul.f32 1.442695, %v730_v39 }
 0x31b   : > { %1087 = vpow2.f32 %v731_v40 }
 0x31e   : > { %v666_v41 = vpop.xlane.xlu0 %665  ;;  %v742_v42 = vpop.permute.xlu1 %741 }
 0x31f   : > { %v747_v43 = vsel %vm534_vm3, %v742_v42, 0  ;;  %1089 = vrcp.f32 %v666_v41 }
 0x320   : > { %756 = vmatpush.bf16.msra.mxu0 %v747_v43 }
 0x321   : > { %v1088_v44 = vpop.eup %1087 }
 0x322   : > { %v733_v45 = vpack.c.bf16 %v1088_v44, %v1088_v44 }
 0x324   : > { %962 = vmatmul.msk.bf16.vlgmr.msra.gmra.mxu0 %vm500_vm2, %v733_v45  ;;  %v734_v46 = vunpack.c.l.bf16 %v733_v45 }
 0x325   : > { %v1090_v47 = vpop.eup %1089 }
 0x326   : > { %v735_v48 = vsel %vm500_vm2, %v734_v46, 0.0  ;;  %v692_v49 = vmul.f32 %v1090_v47, %v687_v29 }
 0x327   : > { %736 = vadd.xlane.f32.xlu2 %v735_v48 }
 0x32b   : > { %694 = vrot.lane.b32.xlu0 %v692_v49, %s1353_s16  ;;  %s1267_s16 = scalar_lea.hbm %s1675_s18, 16 }
 0x32c   : > { %p1269_p1 = scmp.lt.s32.totalorder %s1267_s16, %s1263_s22 }
 0x32e   : > { %p1270_p10 = por %p1269_p1, %p1268_p13 }
 0x330   : > { %p1271_p0 = pnand %p1270_p10, %p1266_p11 }
 0x349   : > { %v530_v50 = vpop.xlane.xlu1 %529 }
 0x34a   : > { %1091 = vrcp.f32 %v530_v50 }
 0x350   : > { %v1092_v51 = vpop.eup %1091 }
 0x351   : > { %v552_v52 = vmul.f32 %v1092_v51, %v547_v12 }
 0x353   : > { %553 = vst.msk [vmem:[%s1601_s0] sm:$0xff] %vm500_vm2, %v552_v52 }
 0x38a   : > { %v595_v53 = vpop.xlane.xlu0 %594 }
 0x38b   : > { %1093 = vrcp.f32 %v595_v53 }
 0x391   : > { %v1094_v54 = vpop.eup %1093  ;;  %v616_v55 = vpop.f32.mrf.mxu0 }
 0x392   : > { %v621_v56 = vmul.f32 %v1094_v54, %v616_v55 }
 0x394   : > { %623 = vrot.lane.b32.xlu0 %v621_v56, %s1354_s14 }
 0x399   : > { %v618_v57 = vpop.f32.mrf.mxu0 }
 0x39a   : > { %v737_v58 = vpop.xlane.xlu2 %736 }
 0x39b   : > { %1095 = vrcp.f32 %v737_v58 }
 0x39d   : > { %v695_v63 = vpop.permute.xlu0 %694 }
 0x3a1   : > { %v1096_v59 = vpop.eup %1095  ;;  %v758_v60 = vpop.f32.mrf.mxu0 }
 0x3a2   : > { %v763_v61 = vmul.f32 %v1096_v59, %v758_v60 }
 0x3a4   : > { %765 = vrot.lane.b32.xlu0 %v763_v61, %s1355_s7 }
 0x3a9   : > { %v760_v62 = vpop.f32.mrf.mxu0 }
 0x406   : > { %v624_v0 = vpop.permute.xlu0 %623 }
 0x407   : > { %627 = vst.msk [vmem:[%s1601_s0] sm:$0xff] %vm626_vm4, %v624_v0 }
 0x408   : > { %698 = vst.msk [vmem:[%s1601_s0] sm:$0xff] %vm697_vm5, %v695_v63 }
 0x416   : > { %v766_v1 = vpop.permute.xlu0 %765 }
 0x417   : > { %769 = vst.msk [vmem:[%s1601_s0] sm:$0xff] %vm768_vm6, %v766_v1 }
 0x418   : > { %1274 = shalt.err (!%p1271_p0)
}
 0x419   : > { %987 = dma.vmem_to_hbm [thread:$0]  (%p1447_p8), %s785_s19, 128, %s787_s12, %s771_s20  }
 0x41a PF: > { %s1676_s10 = sld [smem:[#allocation19_spill]]  ;;  %p1679_p3 = scmp.ge.s32.totalorder %s1341_s29, 2 }
 0x41b   : > { %s1677_s0 = sld [smem:[#allocation20_spill]] }
 0x420   : > { %s798_s7 = sand.u32 1, %s1676_s10  }
 0x421   : > { %p1678_p2 = scmp.ne.s32.totalorder %s1677_s0, 0  ;;  %s799_s24 = scalar_lea.sflag [#allocation6], %s798_s7 }
 0x423   : > { %p1007_p5 = pnand %p1679_p3, %p1678_p2 }
 0x425   : > { %p1008_p7 = pneg %p1007_p5 }
 0x427   : > { %1316 = dma.done.wait (%p1008_p7), %s799_s24, 128  }
 0x428   : > { %1318 = vsyncadd (%p1008_p7), %s799_s24, 4294967168  ;;  %s23_s29 = sadd.s32 1, %s1341_s29   ;;  %s1680_s24 = smov %s1325_s25 }
 0x429   : > { %p20_p6 = scmp.ge.s32.totalorder %s23_s29, 4   ;;  %s1681_s25 = smov %s1329_s26 }
 0x42a   : > { %s1682_s26 = smov %s1519_s13  ;;  %s1683_s27 = smov %s1337_s28 }
 0x42b   : > { %s1684_s28 = smov %s1686_s8  ;;  %22 = sbr.rel (!%p20_p6) target bundleno = 10 (0xa), region = 117 }
 0x430   :  { %805 = vsyncpa [#allocation5], 1 }
 0x431   :  { %807 = vsyncpa [#allocation5 + $0x1], 1 }
 0x432   :  { %808 = vsyncpa [#allocation8], 1 }
 0x433   :  { %809 = vsyncpa [#allocation11], 1 }
 0x434   :  { %810 = vsyncpa [#allocation6], 1 }
 0x435   :  { %812 = vsyncpa [#allocation6 + $0x1], 1 }

</bundles_post_ra>
